<compile_context>
chip_gen: v6e
topology: v6e:2x2x1
jax: 0.10.0
libtpu: 0.0.40
codegen_flags: <defaults>
</compile_context>

<pallas_src>
import jax
import jax.numpy as jnp
from jax.experimental import pallas as pl
from jax.experimental.pallas import tpu as pltpu

_TILE_BYTES = 8 * 1024 * 1024      # per-buffer VMEM tile (4x with dbl-buffered in+out)
_VMEM_LIMIT = 48 << 20             # scoped VMEM limit: safe on v5e/v6e/v7x
_MAX_COLS = 4096                   # cap on the lane-dense last dim
_MIN_SPLIT_BYTES = 1 << 20         # force >=2 blocks above this size (megacore)


def _relu_kernel(x_ref, o_ref):
    # Pure VPU elementwise max(x, 0) on the whole lane-dense VMEM tile.
    o_ref[...] = jnp.maximum(x_ref[...], jnp.zeros((), x_ref.dtype))


def _sublane_multiple(dtype) -> int:
    # f32 -> 8, bf16 -> 16, int8/fp8 -> 32 (sub-32-bit packs along sublanes).
    itemsize = jnp.dtype(dtype).itemsize
    return max(8, 32 // itemsize)


def _round_up(a: int, b: int) -> int:
    return ((a + b - 1) // b) * b


def _pick_cols(total: int) -> int:
    """Largest multiple-of-128 divisor of `total`, capped at _MAX_COLS."""
    best = 128
    c = 128
    while c <= _MAX_COLS:
        if total % c == 0:
            best = c
        c += 128
    return best


def _relu_2d(x2d: jax.Array) -> jax.Array:
    rows, cols = x2d.shape
    dtype = x2d.dtype
    itemsize = jnp.dtype(dtype).itemsize
    sub = _sublane_multiple(dtype)

    row_bytes = cols * itemsize
    target_rows = max(sub, _TILE_BYTES // row_bytes)

    num_blocks = pl.cdiv(rows, target_rows)
    if num_blocks < 2 and rows >= 2 * sub and rows * row_bytes >= _MIN_SPLIT_BYTES:
        num_blocks = 2          # give both v7x TensorCores work on mid-size inputs
    if num_blocks <= 1:
        block_rows = rows       # single block == full extent (always legal)
    else:
        # Round block height to a sublane group so the masked edge block wastes
        # at most one sublane group of rows (no wrapper-side padding needed).
        block_rows = min(rows, _round_up(pl.cdiv(rows, num_blocks), sub))

    grid = (pl.cdiv(rows, block_rows),)

    return pl.pallas_call(
        _relu_kernel,
        out_shape=jax.ShapeDtypeStruct((rows, cols), dtype),
        grid=grid,
        in_specs=[pl.BlockSpec((block_rows, cols), lambda i: (i, 0))],
        out_specs=pl.BlockSpec((block_rows, cols), lambda i: (i, 0)),
        compiler_params=pltpu.CompilerParams(
            dimension_semantics=("parallel",),
            vmem_limit_bytes=_VMEM_LIMIT,
        ),
        cost_estimate=pl.CostEstimate(
            flops=rows * cols,
            transcendentals=0,
            bytes_accessed=2 * rows * cols * itemsize,
        ),
    )(x2d)


def relu_pallas(x: jax.Array) -> jax.Array:
    """ReLU over an arbitrary-shaped array via a tiled, pipelined Pallas kernel."""
    orig_shape = x.shape
    total = x.size
    if total == 0:
        return x

    if total % 128 == 0:
        # Lane-dense slab whose last dim exactly divides the element count:
        # no pad, no slice-back, unmasked vst stores.
        cols = _pick_cols(total)
        x2d = x.reshape(-1, cols)
    else:
        # Ragged total (rare): keep the trailing dim, tile the leading ones.
        # Last-dim stores may be masked, but there is still no extra HBM pass.
        last = orig_shape[-1] if x.ndim else 1
        x2d = x.reshape(-1, last)

    return _relu_2d(x2d).reshape(orig_shape)


if __name__ == "__main__":
    key = jax.random.PRNGKey(0)
    # Small NCHW input consistent with SJ.forward (batch=2, C=4, H=W=16).
    x = jax.random.normal(key, (2, 4, 16, 16), dtype=jnp.float32)

    y = relu_pallas(x)
    jax.block_until_ready(y)

    # Correctness check against the pure-JAX reference.
    y_ref = jnp.maximum(x, 0.0)
    assert y.shape == x.shape and y.dtype == x.dtype
    assert bool(jnp.allclose(y, y_ref)), "ReLU kernel mismatch"

    print("KERNEL_OK")
</pallas_src>

<mosaic_0001>
module attributes {stable_mosaic.version = 11 : i64} {
  func.func @_relu_kernel(%arg0: i32, %arg1: memref<1x2048xf32, #tpu.memory_space<vmem>>, %arg2: memref<1x2048xf32, #tpu.memory_space<vmem>>) attributes {dimension_semantics = [#tpu.dimension_semantics<parallel>], iteration_bounds = array<i64: 1>, scalar_prefetch = 0 : i64, scratch_operands = 0 : i64, tpu.core_type = #tpu.core_type<tc>, window_params = [{transform_indices = @transform_0, window_bounds = array<i64: 1, 2048>}, {transform_indices = @transform_1, window_bounds = array<i64: 1, 2048>}]} {
    %c0 = arith.constant 0 : index
    %c0_0 = arith.constant 0 : index
    %0 = vector.load %arg1[%c0, %c0_0] : memref<1x2048xf32, #tpu.memory_space<vmem>>, vector<1x2048xf32>
    %cst = arith.constant 0.000000e+00 : f32
    %1 = vector.broadcast %cst : f32 to vector<1x2048xf32>
    %2 = arith.maximumf %0, %1 : vector<1x2048xf32>
    %c0_1 = arith.constant 0 : index
    %c0_2 = arith.constant 0 : index
    %3 = vector.load %arg2[%c0_1, %c0_2] : memref<1x2048xf32, #tpu.memory_space<vmem>>, vector<1x2048xf32>
    tpu.vector_store %arg2[%c0_1, %c0_2], %2 {strides = array<i32>} : memref<1x2048xf32, #tpu.memory_space<vmem>>, vector<1x2048xf32>,
    return
  }
  func.func @transform_0(%arg0: i32) -> (i32, i32) {
    %c0_i32 = arith.constant 0 : i32
    %c0_i32_0 = arith.constant 0 : i32
    return %arg0, %c0_i32 : i32, i32
  }
  func.func @transform_1(%arg0: i32) -> (i32, i32) {
    %c0_i32 = arith.constant 0 : i32
    %c0_i32_0 = arith.constant 0 : i32
    return %arg0, %c0_i32 : i32, i32
  }
}

</mosaic_0001>

<bundles_post_ra>
// kernel: tpu_custom_call.1
= control target key start
LH: loop header
LB: loop body
LE: loop exit
PB: predicated region body
PF: predicated region fallthrough
CT: control target
= control target key end

     0   :  { %6 = vsyncpa [#allocation3], 0  ;;  %s106_s0 = inlined_call_operand.hbm [shape: f32[1,2048], index: 0, kind: input, shape index: {}]   ;;  %s107_s1 = inlined_call_operand.hbm [shape: f32[1,2048], index: 1, kind: output, shape index: {}]  }
   0x1   :  { %7 = vsyncpa [#allocation4], 0  ;;  %s88_s6 = smov [#allocation2]  }
   0x2   :  { %s14_s7 = sshll.u32 %s88_s6, 4  ;;  %s15_s7 = int_to_ptr.vmem [resolvable:$true] %s14_s7 }
   0x3   :  { %s52_s8 = scalar_lea.vmem %s15_s7, 256  ;;  %p57_p1 = scmp.lt.s32.totalorder %s15_s7, %s15_s7 }
   0x4   :  { %p53_p0 = scmp.ne.s32.totalorder %s15_s7, %s52_s8  ;;  %p58_p2 = scmp.lt.s32.totalorder %s52_s8, %s52_s8 }
   0x6   :  { %p59_p3 = por %p58_p2, %p57_p1 }
   0x8   :  { %p60_p4 = pnand %p59_p3, %p53_p0 }
   0xa   :  { %63 = shalt.err (!%p60_p4)
}
   0xb   :  { %17 = dma.hbm_to_vmem [thread:$0]  %s106_s0, 256, %s15_s7, [#allocation3]  }
   0xc   :  { %84 = dma.done.wait [#allocation3], 256  }
   0xd   :  { %85 = vsyncadd [#allocation3], 4294967040  ;;  %s89_s11 = smov [#allocation5]   ;;  %v21_v0 = vld [vmem:[#allocation2] sm:$0xff]  ;;  %v22_v1 = vld [vmem:[#allocation2 + $0x8] sm:$0xff] }
   0xe   :  { %s33_s12 = sshll.u32 %s89_s11, 4  ;;  %v23_v2 = vmax.f32 %v21_v0, 0.0  ;;  %v24_v3 = vmax.f32 %v22_v1, 0.0  ;;  %s34_s12 = int_to_ptr.vmem [resolvable:$true] %s33_s12 }
   0xf   :  { %s64_s13 = scalar_lea.vmem %s34_s12, 256  ;;  %p69_p6 = scmp.lt.s32.totalorder %s34_s12, %s34_s12 }
  0x10   :  { %25 = vst [vmem:[#allocation5] sm:$0xff] %v23_v2  ;;  %26 = vst [vmem:[#allocation5 + $0x8] sm:$0xff] %v24_v3  ;;  %p65_p5 = scmp.ne.s32.totalorder %s34_s12, %s64_s13  ;;  %p70_p7 = scmp.lt.s32.totalorder %s64_s13, %s64_s13 }
  0x12   :  { %p71_p8 = por %p70_p7, %p69_p6 }
  0x14   :  { %p72_p9 = pnand %p71_p8, %p65_p5 }
  0x16   :  { %75 = shalt.err (!%p72_p9)
}
  0x17   :  { %36 = dma.vmem_to_hbm [thread:$0]  %s34_s12, 256, %s107_s1, [#allocation4]  }
  0x18   :  { %86 = dma.done.wait [#allocation4], 256  }
  0x19   :  { %87 = vsyncadd [#allocation4], 4294967040 }
  0x1a   :  { %40 = vsyncpa [#allocation3], 1 }
  0x1b   :  { %41 = vsyncpa [#allocation4], 1 }

</bundles_post_ra>
